<compile_context>
chip_gen: v5e
topology: v5e:2x2
jax: 0.10.0
libtpu: 0.0.40
codegen_flags: <defaults>
</compile_context>

<pallas_src>
import functools
import math

import jax
import jax.numpy as jnp
from jax import lax
from jax.experimental import pallas as pl
from jax.experimental.pallas import tpu as pltpu

C_IN = 1
C_OUT = 20
KH = KW = 3
TAPS = KH * KW
K_MAT = TAPS + 1          # 9 taps + ones row (bias folded into the matmul)
LANE = 128
CAP_LANES = 32768         # lane-tile cap (perf review: 16K-32K lanes per step)


def conv_block_kernel(w_ref, x_ref, o_ref, *, width):
    # w_ref: VMEM f32[C_OUT, 10]  (columns ordered kw*3 + kh, column 9 = bias)
    # x_ref: VMEM f32[1, 3, T]    (3 h-shifted flattened planes for this tile)
    # o_ref: VMEM f32[1, C_OUT, T]
    x3 = x_ref[0]                                    # (3, T)
    t = x3.shape[-1]

    # Column-within-row index of every lane.  Valid because the tile size is a
    # multiple of W, so lane j of this tile has image column w == j % W.
    col = lax.broadcasted_iota(jnp.int32, (1, t), 1) % width
    mask_l = (col > 0).astype(jnp.float32)           # w-1 in range
    mask_r = (col < width - 1).astype(jnp.float32)   # w+1 in range

    # w-shifted taps built in VMEM (XLU lane rotations).  The lanes that wrap
    # around the tile edge are exactly the masked (w==0 / w==W-1) lanes.
    left = pltpu.roll(x3, 1, axis=1) * mask_l        # value at (h+kh-1, w-1)
    right = pltpu.roll(x3, t - 1, axis=1) * mask_r   # roll by -1 (mod T): (.., w+1)
    ones = jnp.ones((1, t), dtype=jnp.float32)       # bias row

    taps = jnp.concatenate([left, x3, right, ones], axis=0)   # (10, T)

    acc = jnp.dot(w_ref[...], taps, preferred_element_type=jnp.float32)
    o_ref[0] = jnp.maximum(acc, 0.0).astype(o_ref.dtype)      # activation = ReLU


@jax.jit
def conv_block(x, weight, bias):
    """x: (N, 1, H, W) f32, weight: (C_OUT, 1, 3, 3) f32, bias: (C_OUT,) f32."""
    N, C, H, W = x.shape
    assert C == C_IN
    x = x.astype(jnp.float32)

    P1 = H * W
    # Lane tile: multiple of lcm(W, 128) so (a) stores stay lane-dense and
    # (b) every tile starts at w == 0 (the in-kernel masks rely on this).
    unit = (W * LANE) // math.gcd(W, LANE)
    n_units = pl.cdiv(P1, unit)
    cap_units = max(1, CAP_LANES // unit)
    units_per_tile = max(1, min(cap_units, pl.cdiv(n_units, 2)))  # keep >= 2 tiles
    num_tiles = pl.cdiv(n_units, units_per_tile)
    tile = units_per_tile * unit
    hwp = num_tiles * tile

    # Pad once, on the image side: 1 halo row top/bottom for the conv plus
    # extra zero rows so the flattened pixel count is exactly num_tiles*tile.
    extra_rows = (hwp - P1) // W
    x_h = jnp.pad(x[:, 0, :, :], ((0, 0), (1, 1 + extra_rows), (0, 0)))
    hh = H + extra_rows
    # 3 h-shifted planes, flattened over (h, w):
    #   x3[n, kh, h*W + w] = x_h[n, h + kh, w] = X(h + kh - 1, w)
    planes = jnp.stack([x_h[:, kh:kh + hh, :] for kh in range(KH)], axis=1)
    x3 = planes.reshape(N, KH, hwp)

    # Weight columns ordered kw*3 + kh (matches in-kernel tap order
    # [left kh=0..2, mid kh=0..2, right kh=0..2]); bias folded as column 9.
    w_kwkh = jnp.transpose(weight[:, 0, :, :], (0, 2, 1)).reshape(C_OUT, TAPS)
    w10 = jnp.concatenate(
        [w_kwkh.astype(jnp.float32), bias.reshape(C_OUT, 1).astype(jnp.float32)],
        axis=1)

    cost = pl.CostEstimate(
        flops=2 * C_OUT * K_MAT * N * hwp,
        transcendentals=0,
        bytes_accessed=4 * (KH * N * hwp + C_OUT * N * hwp + C_OUT * K_MAT),
    )

    out_flat = pl.pallas_call(
        functools.partial(conv_block_kernel, width=W),
        out_shape=jax.ShapeDtypeStruct((N, C_OUT, hwp), jnp.float32),
        grid=(N, num_tiles),
        in_specs=[
            pl.BlockSpec((C_OUT, K_MAT), lambda n, i: (0, 0)),    # weights+bias (resident)
            pl.BlockSpec((1, KH, tile), lambda n, i: (n, 0, i)),  # 3 h-planes
        ],
        out_specs=pl.BlockSpec((1, C_OUT, tile), lambda n, i: (n, 0, i)),
        compiler_params=pltpu.CompilerParams(
            dimension_semantics=("parallel", "parallel"),
            # Headroom for 32K-lane tiles; still well under v7x's 64 MiB VMEM.
            vmem_limit_bytes=48 * 1024 * 1024,
        ),
        cost_estimate=cost,
    )(w10, x3)

    # (N, C_OUT, HWp) -> (N, C_OUT, H, W).  The slice is a no-op when H*W is
    # already a tile multiple (true for the test shape); no transpose needed.
    out = out_flat[:, :, :P1].reshape(N, C_OUT, H, W)
    return out


def _reference(x, weight, bias):
    y = lax.conv_general_dilated(
        x, weight, window_strides=(1, 1), padding="SAME",
        dimension_numbers=("NCHW", "OIHW", "NCHW"))
    y = y + bias.reshape(1, C_OUT, 1, 1)
    return jnp.maximum(y, 0.0)


if __name__ == "__main__":
    key = jax.random.PRNGKey(0)
    k_x, k_w, k_b = jax.random.split(key, 3)

    N, H, W = 2, 16, 16
    x = jax.random.normal(k_x, (N, C_IN, H, W), dtype=jnp.float32)

    # Deterministic parameter init (kaiming-uniform-like bounds, as in nn.Conv2d)
    fan_in = C_IN * KH * KW
    bound = 1.0 / (fan_in ** 0.5)
    weight = jax.random.uniform(k_w, (C_OUT, C_IN, KH, KW),
                                minval=-bound, maxval=bound, dtype=jnp.float32)
    bias = jax.random.uniform(k_b, (C_OUT,),
                              minval=-bound, maxval=bound, dtype=jnp.float32)

    out = conv_block(x, weight, bias)
    out = jax.block_until_ready(out)

    ref = _reference(x, weight, bias)
    assert out.shape == (N, C_OUT, H, W)
    assert jnp.allclose(out, ref, atol=1e-5, rtol=1e-5)

    print("KERNEL_OK")
</pallas_src>

<mosaic_0001>
module attributes {stable_mosaic.version = 11 : i64} {
  func.func @conv_block_kernel(%arg0: i32, %arg1: i32, %arg2: memref<20x10xf32, #tpu.memory_space<vmem>>, %arg3: memref<1x3x128xf32, #tpu.memory_space<vmem>>, %arg4: memref<1x20x128xf32, #tpu.memory_space<vmem>>) attributes {dimension_semantics = [#tpu.dimension_semantics<parallel>, #tpu.dimension_semantics<parallel>], iteration_bounds = array<i64: 2, 2>, scalar_prefetch = 0 : i64, scratch_operands = 0 : i64, tpu.core_type = #tpu.core_type<tc>, window_params = [{pipeline_mode = #tpu.pipeline_mode<synchronous>, transform_indices = @transform_0, window_bounds = array<i64: 20, 10>}, {transform_indices = @transform_1, window_bounds = array<i64: 1, 3, 128>}, {transform_indices = @transform_2, window_bounds = array<i64: 1, 20, 128>}]} {
    %c0 = arith.constant 0 : index
    %c0_0 = arith.constant 0 : index
    %c0_1 = arith.constant 0 : index
    %0 = vector.load %arg3[%c0, %c0_0, %c0_1] : memref<1x3x128xf32, #tpu.memory_space<vmem>>, vector<1x3x128xf32>
    %1 = vector.shape_cast %0 : vector<1x3x128xf32> to vector<3x128xf32>
    %2 = tpu.iota {dimensions = array<i32: 1>} : vector<1x128xi32>
    %c16_i32 = arith.constant 16 : i32
    %c0_i32 = arith.constant 0 : i32
    %3 = arith.cmpi eq, %c16_i32, %c0_i32 : i32
    %c1_i32 = arith.constant 1 : i32
    %4 = arith.select %3, %c1_i32, %c16_i32 : i32
    %5 = vector.broadcast %4 : i32 to vector<1x128xi32>
    %6 = arith.remsi %2, %5 : vector<1x128xi32>
    %c0_i32_2 = arith.constant 0 : i32
    %7 = vector.broadcast %c0_i32_2 : i32 to vector<1x128xi32>
    %8 = arith.cmpi ne, %6, %7 : vector<1x128xi32>
    %c0_i32_3 = arith.constant 0 : i32
    %9 = vector.broadcast %c0_i32_3 : i32 to vector<1x128xi32>
    %10 = arith.cmpi slt, %6, %9 : vector<1x128xi32>
    %c0_i32_4 = arith.constant 0 : i32
    %11 = arith.cmpi slt, %4, %c0_i32_4 : i32
    %12 = vector.broadcast %11 : i1 to vector<1x128xi1>
    %13 = vector.broadcast %12 : vector<1x128xi1> to vector<1x128xi1>
    %14 = arith.xori %10, %13 : vector<1x128xi1>
    %15 = arith.andi %14, %8 : vector<1x128xi1>
    %16 = vector.broadcast %4 : i32 to vector<1x128xi32>
    %17 = arith.addi %6, %16 : vector<1x128xi32>
    %18 = arith.select %15, %17, %6 : vector<1x128xi1>, vector<1x128xi32>
    %c0_i32_5 = arith.constant 0 : i32
    %19 = vector.broadcast %c0_i32_5 : i32 to vector<1x128xi32>
    %20 = arith.cmpi sgt, %18, %19 : vector<1x128xi32>
    %21 = arith.extui %20 : vector<1x128xi1> to vector<1x128xi32>
    %22 = arith.sitofp %21 : vector<1x128xi32> to vector<1x128xf32>
    %c15_i32 = arith.constant 15 : i32
    %23 = vector.broadcast %c15_i32 : i32 to vector<1x128xi32>
    %24 = arith.cmpi slt, %18, %23 : vector<1x128xi32>
    %25 = arith.extui %24 : vector<1x128xi1> to vector<1x128xi32>
    %26 = arith.sitofp %25 : vector<1x128xi32> to vector<1x128xf32>
    %c1_i32_6 = arith.constant 1 : i32
    %27 = tpu.dynamic_rotate %1 by %c1_i32_6 dim 1 : vector<3x128xf32>, i32 -> vector<3x128xf32>
    %28 = vector.broadcast %22 : vector<1x128xf32> to vector<3x128xf32>
    %29 = arith.mulf %27, %28 : vector<3x128xf32>
    %c127_i32 = arith.constant 127 : i32
    %30 = tpu.dynamic_rotate %1 by %c127_i32 dim 1 : vector<3x128xf32>, i32 -> vector<3x128xf32>
    %31 = vector.broadcast %26 : vector<1x128xf32> to vector<3x128xf32>
    %32 = arith.mulf %30, %31 : vector<3x128xf32>
    %cst = arith.constant 1.000000e+00 : f32
    %33 = vector.broadcast %cst : f32 to vector<1x128xf32>
    %34 = tpu.concatenate %29, %1, %32, %33 in 0 : vector<3x128xf32>, vector<3x128xf32>, vector<3x128xf32>, vector<1x128xf32> -> vector<10x128xf32>
    %c0_7 = arith.constant 0 : index
    %c0_8 = arith.constant 0 : index
    %35 = vector.load %arg2[%c0_7, %c0_8] : memref<20x10xf32, #tpu.memory_space<vmem>>, vector<20x10xf32>
    %cst_9 = arith.constant dense<0.000000e+00> : vector<20x128xf32>
    %36 = tpu.matmul %35, %34, %cst_9 {dimension_numbers = #tpu.dot_dimension_numbers<[1], [0], [0], [1], [0, 0, 1, 1], [], []>} : vector<20x10xf32>, vector<10x128xf32>, vector<20x128xf32> -> vector<20x128xf32>
    %cst_10 = arith.constant 0.000000e+00 : f32
    %37 = vector.broadcast %cst_10 : f32 to vector<20x128xf32>
    %38 = arith.maximumf %36, %37 : vector<20x128xf32>
    %c0_11 = arith.constant 0 : index
    %c0_12 = arith.constant 0 : index
    %c0_13 = arith.constant 0 : index
    %39 = vector.load %arg4[%c0_11, %c0_12, %c0_13] : memref<1x20x128xf32, #tpu.memory_space<vmem>>, vector<1x20x128xf32>
    %40 = vector.shape_cast %39 : vector<1x20x128xf32> to vector<20x128xf32>
    %41 = vector.shape_cast %38 : vector<20x128xf32> to vector<1x20x128xf32>
    tpu.vector_store %arg4[%c0_11, %c0_12, %c0_13], %41 {strides = array<i32>} : memref<1x20x128xf32, #tpu.memory_space<vmem>>, vector<1x20x128xf32>,
    return
  }
  func.func @transform_0(%arg0: i32, %arg1: i32) -> (i32, i32) {
    %c0_i32 = arith.constant 0 : i32
    %c0_i32_0 = arith.constant 0 : i32
    %c0_i32_1 = arith.constant 0 : i32
    return %c0_i32, %c0_i32_0 : i32, i32
  }
  func.func @transform_1(%arg0: i32, %arg1: i32) -> (i32, i32, i32) {
    %c0_i32 = arith.constant 0 : i32
    %c0_i32_0 = arith.constant 0 : i32
    return %arg0, %c0_i32, %arg1 : i32, i32, i32
  }
  func.func @transform_2(%arg0: i32, %arg1: i32) -> (i32, i32, i32) {
    %c0_i32 = arith.constant 0 : i32
    %c0_i32_0 = arith.constant 0 : i32
    return %arg0, %c0_i32, %arg1 : i32, i32, i32
  }
}

</mosaic_0001>

<bundles_post_ra>
// kernel: conv_block.1
= control target key start
LH: loop header
LB: loop body
LE: loop exit
PB: predicated region body
PF: predicated region fallthrough
CT: control target
= control target key end

     0   :  { %s528_s9 = smov 0   ;;  %s530_s10 = smov 0   ;;  %s632_s0 = inlined_call_operand.vmem [shape: f32[20,10], index: 0, kind: input, shape index: {}]   ;;  %s633_s1 = inlined_call_operand.vmem [shape: f32[2,3,256], index: 1, kind: input, shape index: {}]   ;;  %s634_s2 = inlined_call_operand.vmem [shape: f32[2,20,256], index: 2, kind: output, shape index: {}]  }
   0x1   :  { %s532_s11 = smov 0   ;;  %s534_s12 = smov 0  }
   0x2   :  { %s536_s13 = smov 0   ;;  %s538_s14 = smov 0  }
   0x3   :  { %s540_s15 = smov 0  }
   0x4 LB: > { %s21_s16 = sadd.s32 1, %s500_s13  ;;  %s24_s17 = sadd.s32 1, %s504_s14  ;;  %s508_s15 = sphi %s540_s15, %s12_s15   ;;  %s504_s14 = sphi %s538_s14, %s641_s14   ;;  %s500_s13 = sphi %s536_s13, %s640_s13   ;;  %s496_s12 = sphi %s534_s12, %s639_s12   ;;  %s492_s11 = sphi %s532_s11, %s638_s11   ;;  %s488_s10 = sphi %s530_s10, %s637_s10   ;;  %s484_s9 = sphi %s528_s9, %s636_s9  }
   0x5   : > { %p22_p0 = scmp.ge.s32.totalorder %s21_s16, 2  ;;  %s373_s18 = sadd.s32 4294967295, %s508_s15  }
   0x6   : > { %p92_p1 = scmp.ne.s32.totalorder %s488_s10, %s484_s9  ;;  %p93_p2 = scmp.eq.s32.totalorder %s373_s18, 3 }
   0x7   : > { %s643_s16 = smov (%p22_p0, %s21_s16), 0  ;;  %s645_s17 = smov (!%p22_p0, %s24_s17), %s504_s14 }
   0x8   : > { %s78_s19 = ssub.s32 %s500_s13, %s643_s16  ;;  %p26_p3 = scmp.ge.s32.totalorder %s645_s17, 2 }
   0x9   : > { %p377_p4 = scmp.ge.s32.totalorder %s508_s15, 1  ;;  %p574_p5 = por %p93_p2, %p92_p1 }
   0xa   : > { %p131_p6 = scmp.lt.s32.totalorder %s508_s15, 5  ;;  %s647_s17 = smov (%p26_p3, %s645_s17), 0 }
   0xb   : > { %s77_s21 = ssub.s32 %s504_s14, %s647_s17  ;;  %s82_s23 = sadd.s32 1, %s488_s10 }
   0xc   : > { %p132_p7 = pnand %p377_p4, %p131_p6  ;;  %s79_s22 = sor.u32 %s78_s19, %s77_s21 }
   0xd   : > { %p80_p8 = scmp.eq.s32.totalorder %s79_s22, 0  ;;  %p155_p9 = scmp.lt.s32.totalorder (!%p132_p7), %s496_s12, 1 }
   0xe   : > { %135 = sbr.rel (%p132_p7) target bundleno = 298 (0x12a), region = 28  ;;  %p157_p10 = scmp.lt.s32.totalorder (!%p132_p7), %s492_s11, 1 }
   0xf   : > { %s585_s24 = scalar_select %p80_p8, %s488_s10, %s82_s23  }
  0x10   : > { %s510_s5 = smov (!%p132_p7), 127   ;;  %s511_s6 = smov (!%p132_p7), 1  }
  0x11   : > { %s152_s23 = sand.u32 (!%p132_p7), 1, %s484_s9  }
  0x13   : > { %s156_s25 = scalar_select %p155_p9, %s496_s12, 1  ;;  %v164_v1 = vlaneseq  ;;  %v512_v4 = vmov 0.0   ;;  %vm200_vm1 = vcmask 1040384   ;;  %vm215_vm2 = vcmask 1041408   ;;  %v202_v15 = vld [vmem:[%s632_s0] sm:$0xff]  ;;  %v203_v18 = vld [vmem:[%s632_s0 + $0x8] sm:$0xff] }
  0x14   : > { %s158_s26 = scalar_select %p157_p10, %s492_s11, 1  ;;  %vm196_vm4 = vcmask 1042432   ;;  %vm198_vm5 = vcmask 1045504   ;;  %v204_v17 = vld [vmem:[%s632_s0 + $0x10] sm:$0xf]  ;;  %vm205_vm6 = vcmask 80896  }
  0x15   : > { %s378_s27 = sshll.u32 %s156_s25, 1  ;;  %v165_v2 = vand.u32 127, %v164_v1  ;;  %s393_s25 = smul.u32 24, %s152_s23 }
  0x16   : > { %s160_s28 = sadd.s32 %s378_s27, %s158_s26  ;;  %s394_s27 = smul.u32 (%p574_p5), 6, %s496_s12 }
  0x17   : > { %s379_s29 = sshll.u32 %s160_s28, 2  ;;  %v170_v3 = vand.u32 15, %v165_v2  ;;  %s154_s26 = scalar_lea.vmem [#allocation2], %s393_s25 }
  0x18   : > { %s162_s4 = scalar_lea.vmem %s633_s1, %s379_s29  ;;  %s259_s28 = sadd.s32 (%p574_p5), %s492_s11, %s394_s27 }
  0x19   : > { %v163_v0 = vld [vmem:[%s162_s4] sm:$0x7]  ;;  %vm181_vm0 = vcmp.lt.s32.totalorder %v170_v3, 15  ;;  %vm178_vm3 = vcmp.gt.s32.totalorder %v170_v3, 0  ;;  %s386_s9 = sshll.u32 (%p574_p5), %s259_s28, 3 }
  0x1a   : > { %187 = vrot.lane.b32.xlu0 %v163_v0, %s510_s5  ;;  %v381_v5 = vsel %vm181_vm0, 1.0, %v512_v4  ;;  %v380_v10 = vsel %vm178_vm3, 1.0, %v512_v4  ;;  %v191_v11 = vrot.slane %v163_v0, 5  ;;  %s261_s3 = scalar_lea.vmem (%p574_p5), %s634_s2, %s386_s9 }
  0x22   : > { %184 = vrot.lane.b32.xlu0 %v163_v0, %s511_s6 }
  0x8c   : > { %v188_v6 = vpop.permute.xlu0 %187 }
  0x8d   : > { %v189_v7 = vmul.f32 %v381_v5, %v188_v6 }
  0x8f   : > { %v194_v8 = vrot.slane %v189_v7, 2 }
  0x91   : > { %v201_v9 = vsel %vm200_vm1, %v194_v8, 1.0 }
  0x92   : > { %382 = vmatpush.msk.msra.mxu0 %vm215_vm2, %v201_v9  ;;  %389 = vmatpush.msk.msra.mxu1 %vm215_vm2, %v201_v9 }
  0x93   : > { %390 = vmatpush.msk.msra.mxu2 %vm215_vm2, %v201_v9 }
  0x94   : > { %v185_v12 = vpop.permute.xlu0 %184 }
  0x95   : > { %v186_v13 = vmul.f32 %v380_v10, %v185_v12 }
  0x97   : > { %v197_v14 = vsel %vm196_vm4, %v186_v13, %v191_v11 }
  0x98   : > { %v199_v16 = vsel %vm198_vm5, %v197_v14, %v194_v8 }
  0x99   : > { %234 = vmatpush.msra.mxu0 %v199_v16  ;;  %391 = vmatpush.msra.mxu1 %v199_v16 }
  0x9a   : > { %392 = vmatpush.msra.mxu2 %v199_v16  ;;  %383 = vmatmul.msk.f32.vlgmr.msra.gmra.mxu0 %vm205_vm6, %v202_v15 }
  0x9b   : > { %385 = vmatmul.msk.f32.vlgmr.msra.gmra.mxu2 %vm205_vm6, %v204_v17  ;;  %384 = vmatmul.msk.f32.vlgmr.msra.gmra.mxu1 %vm205_vm6, %v203_v18 }
 0x117   : > { %v236_v19 = vpop.f32.mrf.mxu0 }
 0x118   : > { %v245_v20 = vmax.f32 %v236_v19, 0.0  ;;  %v239_v21 = vpop.f32.mrf.mxu1 }
 0x119   : > { %v246_v22 = vmax.f32 %v239_v21, 0.0 }
 0x11a   : > { %248 = vst [vmem:[%s154_s26] sm:$0xff] %v245_v20 }
 0x11b   : > { %249 = vst [vmem:[%s154_s26 + $0x8] sm:$0xff] %v246_v22 }
 0x11d   : > { %257 = sbr.rel (!%p574_p5) target bundleno = 298 (0x12a), region = 32 }
 0x11e   : > { %v242_v23 = vpop.f32.mrf.mxu2 }
 0x11f   : > { %v247_v24 = vmax.f32 %v242_v23, 0.0 }
 0x121   : > { %250 = vst [vmem:[%s154_s26 + $0x10] sm:$0xf] %v247_v24  ;;  %v294_v25 = vld [vmem:[%s154_s26] sm:$0xff] (%p574_p5) }
 0x122   : > { %v296_v26 = vld [vmem:[%s154_s26 + $0x8] sm:$0xff]  ;;  %295 = vst [vmem:[%s261_s3] sm:$0xff] %v294_v25 }
 0x123   : > { %297 = vst [vmem:[%s261_s3 + $0x10] sm:$0xff] %v296_v26 }
 0x128   : > { %v298_v27 = vld [vmem:[%s154_s26 + $0x10] sm:$0xff] }
 0x129   : > { %299 = vst [vmem:[%s261_s3 + $0x20] sm:$0xff] %v298_v27 }
 0x12a PF: > { %s12_s15 = sadd.s32 1, %s508_s15   ;;  %s636_s9 = smov %s488_s10 }
 0x12b   : > { %p9_p11 = scmp.ge.s32.totalorder %s12_s15, 6   ;;  %s637_s10 = smov %s585_s24 }
 0x12c   : > { %s638_s11 = smov %s500_s13  ;;  %s639_s12 = smov %s504_s14 }
 0x12d   : > { %s640_s13 = smov %s643_s16  ;;  %s641_s14 = smov %s647_s17 }
 0x12e   :  { %11 = sbr.rel (!%p9_p11) target bundleno = 4 (0x4), region = 96 }

</bundles_post_ra>
